<compile_context>
chip_gen: v7x
topology: tpu7x:2x2x1
jax: 0.10.0
libtpu: 0.0.40
codegen_flags: <defaults>
</compile_context>

<pallas_src>
from functools import partial

import jax
import jax.numpy as jnp
from jax.experimental import pallas as pl
from jax.experimental.pallas import tpu as pltpu


def _model_kernel(x_ref, w_enc_ref, b_enc_ref, w1_ref, b1_ref,
                  w2_ref, b2_ref, logits_ref, *, n_nodes, feat_dim):
    """One batch-block of the Model forward path.

    x_ref    : (B_blk, N*F)  bf16, lane-dense node features (row = one env)
    w_enc    : (F, D) bf16        b_enc : (1, D) f32
    w1       : (D, H) bf16        b1    : (1, H) f32
    w2       : (H, A_pad) bf16    b2    : (1, A_pad) f32   (lane-padded)
    logits   : (B_blk, A_pad) f32
    """
    cd = x_ref.dtype
    x = x_ref[...]                     # (B_blk, N*F)
    w_enc = w_enc_ref[...]             # (F, D)
    b_enc = b_enc_ref[...]             # (1, D) f32

    # ---- fused node encoder + sum pool: f32 accumulator over N nodes ------
    pooled = None
    for n in range(n_nodes):           # static unroll; N is small
        xn = x[:, n * feat_dim:(n + 1) * feat_dim]          # (B_blk, F)
        h = jnp.dot(xn, w_enc, preferred_element_type=jnp.float32)
        h = jnp.maximum(h + b_enc, 0.0)
        pooled = h if pooled is None else pooled + h

    # ---- mean over nodes (f32, matches module's mean-then-matmul order) ---
    pooled = pooled * (1.0 / n_nodes)

    # ---- FFDecoder layer 1: Linear + ReLU ---------------------------------
    z = jnp.dot(pooled.astype(cd), w1_ref[...],
                preferred_element_type=jnp.float32)
    z = jnp.maximum(z + b1_ref[...], 0.0)

    # ---- FFDecoder layer 2: logits over (lane-padded) action space --------
    logits = jnp.dot(z.astype(cd), w2_ref[...],
                     preferred_element_type=jnp.float32)
    logits_ref[...] = (logits + b2_ref[...]).astype(logits_ref.dtype)


def prepare_params(w_enc, b_enc, w1, b1, w2, b2, *, compute_dtype=jnp.bfloat16):
    """One-time parameter packing (hoisted out of the per-step forward)."""
    F, D = w_enc.shape
    H = w1.shape[1]
    A = w2.shape[1]
    A_pad = pl.cdiv(A, 128) * 128
    w2_p = jnp.zeros((H, A_pad), compute_dtype).at[:, :A].set(
        w2.astype(compute_dtype))
    b2_p = jnp.zeros((1, A_pad), jnp.float32).at[:, :A].set(
        b2.reshape(1, A).astype(jnp.float32))
    return {
        "w_enc": w_enc.astype(compute_dtype),
        "b_enc": b_enc.reshape(1, D).astype(jnp.float32),
        "w1": w1.astype(compute_dtype),
        "b1": b1.reshape(1, H).astype(jnp.float32),
        "w2": w2_p,
        "b2": b2_p,
        "dims": (F, D, H, A, A_pad),
    }


def model_forward(x, params, *, block_b=512, compute_dtype=jnp.bfloat16):
    """x: (B, N, F) node features. Returns logits (B, A) in float32."""
    B, N, F = x.shape
    F_p, D, H, A, A_pad = params["dims"]
    assert F == F_p, "node_feature_dim mismatch with prepared params"

    # ---- batch blocking: >=2 blocks when possible (v7x dual-TC), blocks
    # ---- are multiples of 8 (sublane rule) or equal to the full batch -----
    if B <= 8:
        B_blk = B
        B_pad = B
    else:
        half = pl.cdiv(B, 2)
        B_blk = min(block_b, pl.cdiv(half, 8) * 8)
        B_pad = pl.cdiv(B, B_blk) * B_blk
    grid = (B_pad // B_blk,)

    # Lane-dense feature layout: one contiguous (N*F) row per env.
    x2 = x.reshape(B, N * F).astype(compute_dtype)
    if B_pad != B:
        x2 = jnp.pad(x2, ((0, B_pad - B), (0, 0)))

    const = lambda shape: pl.BlockSpec(shape, lambda i: tuple(0 for _ in shape))

    flops = 2 * B_pad * (N * F * D + D * H + H * A_pad)
    w_bytes = sum(int(params[k].size) * params[k].dtype.itemsize
                  for k in ("w_enc", "b_enc", "w1", "b1", "w2", "b2"))
    bytes_accessed = int(x2.size) * x2.dtype.itemsize + w_bytes + B_pad * A_pad * 4
    cost = pl.CostEstimate(flops=flops, transcendentals=0,
                           bytes_accessed=bytes_accessed)

    out = pl.pallas_call(
        partial(_model_kernel, n_nodes=N, feat_dim=F),
        out_shape=jax.ShapeDtypeStruct((B_pad, A_pad), jnp.float32),
        grid=grid,
        in_specs=[
            pl.BlockSpec((B_blk, N * F), lambda i: (i, 0)),  # node features
            const((F, D)),                                   # encoder weight
            const((1, D)),                                   # encoder bias
            const((D, H)),                                   # decoder W1
            const((1, H)),                                   # decoder b1
            const((H, A_pad)),                               # decoder W2 (padded)
            const((1, A_pad)),                               # decoder b2 (padded)
        ],
        out_specs=pl.BlockSpec((B_blk, A_pad), lambda i: (i, 0)),
        compiler_params=pltpu.CompilerParams(
            dimension_semantics=("parallel",)),
        cost_estimate=cost,
    )(x2, params["w_enc"], params["b_enc"], params["w1"], params["b1"],
      params["w2"], params["b2"])

    return out[:B, :A]


def reference_mixed(x, w_enc, b_enc, w1, b1, w2, b2, compute_dtype=jnp.bfloat16):
    """Pure-JAX reference using the same mixed-precision recipe as the kernel."""
    B, N, F = x.shape
    D = w_enc.shape[1]
    cd = compute_dtype
    h = jnp.dot(x.reshape(B * N, F).astype(cd), w_enc.astype(cd),
                preferred_element_type=jnp.float32)
    h = jnp.maximum(h + b_enc.reshape(1, D).astype(jnp.float32), 0.0)
    pooled = h.reshape(B, N, D).sum(axis=1) * (1.0 / N)        # f32 sum, then mean
    z = jnp.dot(pooled.astype(cd), w1.astype(cd),
                preferred_element_type=jnp.float32)
    z = jnp.maximum(z + b1.reshape(1, -1), 0.0)
    logits = jnp.dot(z.astype(cd), w2.astype(cd),
                     preferred_element_type=jnp.float32)
    return logits + b2.reshape(1, -1)


def reference_f32(x, w_enc, b_enc, w1, b1, w2, b2):
    """Full-precision reference matching the original module semantics."""
    h = jnp.maximum(jnp.einsum("bnf,fd->bnd", x, w_enc)
                    + b_enc.reshape(1, 1, -1), 0.0)
    pooled = jnp.mean(h, axis=1)
    z = jnp.maximum(pooled @ w1 + b1.reshape(1, -1), 0.0)
    return z @ w2 + b2.reshape(1, -1)


if __name__ == "__main__":
    # Small shapes consistent with the module:
    #   batch=2, nodes=16, node_feature_dim=4, embedding_dim=32,
    #   decoder hidden=32, action space n=8
    B, N, F = 2, 16, 4
    D, H, A = 32, 32, 8

    key = jax.random.PRNGKey(0)
    ks = jax.random.split(key, 7)
    x     = jax.random.normal(ks[0], (B, N, F), dtype=jnp.float32)
    w_enc = jax.random.normal(ks[1], (F, D), dtype=jnp.float32) * 0.1
    b_enc = jax.random.normal(ks[2], (1, D), dtype=jnp.float32) * 0.1
    w1    = jax.random.normal(ks[3], (D, H), dtype=jnp.float32) * 0.1
    b1    = jax.random.normal(ks[4], (1, H), dtype=jnp.float32) * 0.1
    w2    = jax.random.normal(ks[5], (H, A), dtype=jnp.float32) * 0.1
    b2    = jax.random.normal(ks[6], (1, A), dtype=jnp.float32) * 0.1

    # One-time parameter packing (hot path is then just the pallas_call).
    params = prepare_params(w_enc, b_enc, w1, b1, w2, b2)
    jax.block_until_ready(params["w2"])

    logits = model_forward(x, params)
    jax.block_until_ready(logits)
    assert logits.shape == (B, A)

    ref_mx = reference_mixed(x, w_enc, b_enc, w1, b1, w2, b2)
    ref_fp = reference_f32(x, w_enc, b_enc, w1, b1, w2, b2)
    assert jnp.allclose(logits, ref_mx, atol=2e-3, rtol=2e-3), \
        "mismatch vs mixed-precision reference"
    assert jnp.allclose(logits, ref_fp, atol=5e-2, rtol=5e-2), \
        "mismatch vs f32 module reference"

    print("KERNEL_OK")
</pallas_src>

<mosaic_0001>
module attributes {stable_mosaic.version = 11 : i64} {
  func.func @_model_kernel(%arg0: i32, %arg1: memref<2x64xbf16, #tpu.memory_space<vmem>>, %arg2: memref<4x32xbf16, #tpu.memory_space<vmem>>, %arg3: memref<1x32xf32, #tpu.memory_space<vmem>>, %arg4: memref<32x32xbf16, #tpu.memory_space<vmem>>, %arg5: memref<1x32xf32, #tpu.memory_space<vmem>>, %arg6: memref<32x128xbf16, #tpu.memory_space<vmem>>, %arg7: memref<1x128xf32, #tpu.memory_space<vmem>>, %arg8: memref<2x128xf32, #tpu.memory_space<vmem>>) attributes {dimension_semantics = [#tpu.dimension_semantics<parallel>], iteration_bounds = array<i64: 1>, scalar_prefetch = 0 : i64, scratch_operands = 0 : i64, tpu.core_type = #tpu.core_type<tc>, window_params = [{transform_indices = @transform_0, window_bounds = array<i64: 2, 64>}, {pipeline_mode = #tpu.pipeline_mode<synchronous>, transform_indices = @transform_1, window_bounds = array<i64: 4, 32>}, {pipeline_mode = #tpu.pipeline_mode<synchronous>, transform_indices = @transform_2, window_bounds = array<i64: 1, 32>}, {pipeline_mode = #tpu.pipeline_mode<synchronous>, transform_indices = @transform_3, window_bounds = array<i64: 32, 32>}, {pipeline_mode = #tpu.pipeline_mode<synchronous>, transform_indices = @transform_4, window_bounds = array<i64: 1, 32>}, {pipeline_mode = #tpu.pipeline_mode<synchronous>, transform_indices = @transform_5, window_bounds = array<i64: 32, 128>}, {pipeline_mode = #tpu.pipeline_mode<synchronous>, transform_indices = @transform_6, window_bounds = array<i64: 1, 128>}, {transform_indices = @transform_7, window_bounds = array<i64: 2, 128>}]} {
    %c0 = arith.constant 0 : index
    %c0_0 = arith.constant 0 : index
    %0 = vector.load %arg1[%c0, %c0_0] : memref<2x64xbf16, #tpu.memory_space<vmem>>, vector<2x64xbf16>
    %c0_1 = arith.constant 0 : index
    %c0_2 = arith.constant 0 : index
    %1 = vector.load %arg2[%c0_1, %c0_2] : memref<4x32xbf16, #tpu.memory_space<vmem>>, vector<4x32xbf16>
    %c0_3 = arith.constant 0 : index
    %c0_4 = arith.constant 0 : index
    %2 = vector.load %arg3[%c0_3, %c0_4] : memref<1x32xf32, #tpu.memory_space<vmem>>, vector<1x32xf32>
    %3 = vector.extract_strided_slice %0 {offsets = [0, 0], sizes = [2, 4], strides = [1, 1]} : vector<2x64xbf16> to vector<2x4xbf16>
    %cst = arith.constant dense<0.000000e+00> : vector<2x32xf32>
    %4 = tpu.matmul %3, %1, %cst {dimension_numbers = #tpu.dot_dimension_numbers<[1], [0], [0], [1], [0, 0, 1, 1], [], []>} : vector<2x4xbf16>, vector<4x32xbf16>, vector<2x32xf32> -> vector<2x32xf32>
    %5 = vector.broadcast %2 : vector<1x32xf32> to vector<2x32xf32>
    %6 = arith.addf %4, %5 : vector<2x32xf32>
    %cst_5 = arith.constant 0.000000e+00 : f32
    %7 = vector.broadcast %cst_5 : f32 to vector<2x32xf32>
    %8 = arith.maximumf %6, %7 : vector<2x32xf32>
    %9 = vector.extract_strided_slice %0 {offsets = [0, 4], sizes = [2, 4], strides = [1, 1]} : vector<2x64xbf16> to vector<2x4xbf16>
    %cst_6 = arith.constant dense<0.000000e+00> : vector<2x32xf32>
    %10 = tpu.matmul %9, %1, %cst_6 {dimension_numbers = #tpu.dot_dimension_numbers<[1], [0], [0], [1], [0, 0, 1, 1], [], []>} : vector<2x4xbf16>, vector<4x32xbf16>, vector<2x32xf32> -> vector<2x32xf32>
    %11 = vector.broadcast %2 : vector<1x32xf32> to vector<2x32xf32>
    %12 = arith.addf %10, %11 : vector<2x32xf32>
    %cst_7 = arith.constant 0.000000e+00 : f32
    %13 = vector.broadcast %cst_7 : f32 to vector<2x32xf32>
    %14 = arith.maximumf %12, %13 : vector<2x32xf32>
    %15 = arith.addf %8, %14 : vector<2x32xf32>
    %16 = vector.extract_strided_slice %0 {offsets = [0, 8], sizes = [2, 4], strides = [1, 1]} : vector<2x64xbf16> to vector<2x4xbf16>
    %cst_8 = arith.constant dense<0.000000e+00> : vector<2x32xf32>
    %17 = tpu.matmul %16, %1, %cst_8 {dimension_numbers = #tpu.dot_dimension_numbers<[1], [0], [0], [1], [0, 0, 1, 1], [], []>} : vector<2x4xbf16>, vector<4x32xbf16>, vector<2x32xf32> -> vector<2x32xf32>
    %18 = vector.broadcast %2 : vector<1x32xf32> to vector<2x32xf32>
    %19 = arith.addf %17, %18 : vector<2x32xf32>
    %cst_9 = arith.constant 0.000000e+00 : f32
    %20 = vector.broadcast %cst_9 : f32 to vector<2x32xf32>
    %21 = arith.maximumf %19, %20 : vector<2x32xf32>
    %22 = arith.addf %15, %21 : vector<2x32xf32>
    %23 = vector.extract_strided_slice %0 {offsets = [0, 12], sizes = [2, 4], strides = [1, 1]} : vector<2x64xbf16> to vector<2x4xbf16>
    %cst_10 = arith.constant dense<0.000000e+00> : vector<2x32xf32>
    %24 = tpu.matmul %23, %1, %cst_10 {dimension_numbers = #tpu.dot_dimension_numbers<[1], [0], [0], [1], [0, 0, 1, 1], [], []>} : vector<2x4xbf16>, vector<4x32xbf16>, vector<2x32xf32> -> vector<2x32xf32>
    %25 = vector.broadcast %2 : vector<1x32xf32> to vector<2x32xf32>
    %26 = arith.addf %24, %25 : vector<2x32xf32>
    %cst_11 = arith.constant 0.000000e+00 : f32
    %27 = vector.broadcast %cst_11 : f32 to vector<2x32xf32>
    %28 = arith.maximumf %26, %27 : vector<2x32xf32>
    %29 = arith.addf %22, %28 : vector<2x32xf32>
    %30 = vector.extract_strided_slice %0 {offsets = [0, 16], sizes = [2, 4], strides = [1, 1]} : vector<2x64xbf16> to vector<2x4xbf16>
    %cst_12 = arith.constant dense<0.000000e+00> : vector<2x32xf32>
    %31 = tpu.matmul %30, %1, %cst_12 {dimension_numbers = #tpu.dot_dimension_numbers<[1], [0], [0], [1], [0, 0, 1, 1], [], []>} : vector<2x4xbf16>, vector<4x32xbf16>, vector<2x32xf32> -> vector<2x32xf32>
    %32 = vector.broadcast %2 : vector<1x32xf32> to vector<2x32xf32>
    %33 = arith.addf %31, %32 : vector<2x32xf32>
    %cst_13 = arith.constant 0.000000e+00 : f32
    %34 = vector.broadcast %cst_13 : f32 to vector<2x32xf32>
    %35 = arith.maximumf %33, %34 : vector<2x32xf32>
    %36 = arith.addf %29, %35 : vector<2x32xf32>
    %37 = vector.extract_strided_slice %0 {offsets = [0, 20], sizes = [2, 4], strides = [1, 1]} : vector<2x64xbf16> to vector<2x4xbf16>
    %cst_14 = arith.constant dense<0.000000e+00> : vector<2x32xf32>
    %38 = tpu.matmul %37, %1, %cst_14 {dimension_numbers = #tpu.dot_dimension_numbers<[1], [0], [0], [1], [0, 0, 1, 1], [], []>} : vector<2x4xbf16>, vector<4x32xbf16>, vector<2x32xf32> -> vector<2x32xf32>
    %39 = vector.broadcast %2 : vector<1x32xf32> to vector<2x32xf32>
    %40 = arith.addf %38, %39 : vector<2x32xf32>
    %cst_15 = arith.constant 0.000000e+00 : f32
    %41 = vector.broadcast %cst_15 : f32 to vector<2x32xf32>
    %42 = arith.maximumf %40, %41 : vector<2x32xf32>
    %43 = arith.addf %36, %42 : vector<2x32xf32>
    %44 = vector.extract_strided_slice %0 {offsets = [0, 24], sizes = [2, 4], strides = [1, 1]} : vector<2x64xbf16> to vector<2x4xbf16>
    %cst_16 = arith.constant dense<0.000000e+00> : vector<2x32xf32>
    %45 = tpu.matmul %44, %1, %cst_16 {dimension_numbers = #tpu.dot_dimension_numbers<[1], [0], [0], [1], [0, 0, 1, 1], [], []>} : vector<2x4xbf16>, vector<4x32xbf16>, vector<2x32xf32> -> vector<2x32xf32>
    %46 = vector.broadcast %2 : vector<1x32xf32> to vector<2x32xf32>
    %47 = arith.addf %45, %46 : vector<2x32xf32>
    %cst_17 = arith.constant 0.000000e+00 : f32
    %48 = vector.broadcast %cst_17 : f32 to vector<2x32xf32>
    %49 = arith.maximumf %47, %48 : vector<2x32xf32>
    %50 = arith.addf %43, %49 : vector<2x32xf32>
    %51 = vector.extract_strided_slice %0 {offsets = [0, 28], sizes = [2, 4], strides = [1, 1]} : vector<2x64xbf16> to vector<2x4xbf16>
    %cst_18 = arith.constant dense<0.000000e+00> : vector<2x32xf32>
    %52 = tpu.matmul %51, %1, %cst_18 {dimension_numbers = #tpu.dot_dimension_numbers<[1], [0], [0], [1], [0, 0, 1, 1], [], []>} : vector<2x4xbf16>, vector<4x32xbf16>, vector<2x32xf32> -> vector<2x32xf32>
    %53 = vector.broadcast %2 : vector<1x32xf32> to vector<2x32xf32>
    %54 = arith.addf %52, %53 : vector<2x32xf32>
    %cst_19 = arith.constant 0.000000e+00 : f32
    %55 = vector.broadcast %cst_19 : f32 to vector<2x32xf32>
    %56 = arith.maximumf %54, %55 : vector<2x32xf32>
    %57 = arith.addf %50, %56 : vector<2x32xf32>
    %58 = vector.extract_strided_slice %0 {offsets = [0, 32], sizes = [2, 4], strides = [1, 1]} : vector<2x64xbf16> to vector<2x4xbf16>
    %cst_20 = arith.constant dense<0.000000e+00> : vector<2x32xf32>
    %59 = tpu.matmul %58, %1, %cst_20 {dimension_numbers = #tpu.dot_dimension_numbers<[1], [0], [0], [1], [0, 0, 1, 1], [], []>} : vector<2x4xbf16>, vector<4x32xbf16>, vector<2x32xf32> -> vector<2x32xf32>
    %60 = vector.broadcast %2 : vector<1x32xf32> to vector<2x32xf32>
    %61 = arith.addf %59, %60 : vector<2x32xf32>
    %cst_21 = arith.constant 0.000000e+00 : f32
    %62 = vector.broadcast %cst_21 : f32 to vector<2x32xf32>
    %63 = arith.maximumf %61, %62 : vector<2x32xf32>
    %64 = arith.addf %57, %63 : vector<2x32xf32>
    %65 = vector.extract_strided_slice %0 {offsets = [0, 36], sizes = [2, 4], strides = [1, 1]} : vector<2x64xbf16> to vector<2x4xbf16>
    %cst_22 = arith.constant dense<0.000000e+00> : vector<2x32xf32>
    %66 = tpu.matmul %65, %1, %cst_22 {dimension_numbers = #tpu.dot_dimension_numbers<[1], [0], [0], [1], [0, 0, 1, 1], [], []>} : vector<2x4xbf16>, vector<4x32xbf16>, vector<2x32xf32> -> vector<2x32xf32>
    %67 = vector.broadcast %2 : vector<1x32xf32> to vector<2x32xf32>
    %68 = arith.addf %66, %67 : vector<2x32xf32>
    %cst_23 = arith.constant 0.000000e+00 : f32
    %69 = vector.broadcast %cst_23 : f32 to vector<2x32xf32>
    %70 = arith.maximumf %68, %69 : vector<2x32xf32>
    %71 = arith.addf %64, %70 : vector<2x32xf32>
    %72 = vector.extract_strided_slice %0 {offsets = [0, 40], sizes = [2, 4], strides = [1, 1]} : vector<2x64xbf16> to vector<2x4xbf16>
    %cst_24 = arith.constant dense<0.000000e+00> : vector<2x32xf32>
    %73 = tpu.matmul %72, %1, %cst_24 {dimension_numbers = #tpu.dot_dimension_numbers<[1], [0], [0], [1], [0, 0, 1, 1], [], []>} : vector<2x4xbf16>, vector<4x32xbf16>, vector<2x32xf32> -> vector<2x32xf32>
    %74 = vector.broadcast %2 : vector<1x32xf32> to vector<2x32xf32>
    %75 = arith.addf %73, %74 : vector<2x32xf32>
    %cst_25 = arith.constant 0.000000e+00 : f32
    %76 = vector.broadcast %cst_25 : f32 to vector<2x32xf32>
    %77 = arith.maximumf %75, %76 : vector<2x32xf32>
    %78 = arith.addf %71, %77 : vector<2x32xf32>
    %79 = vector.extract_strided_slice %0 {offsets = [0, 44], sizes = [2, 4], strides = [1, 1]} : vector<2x64xbf16> to vector<2x4xbf16>
    %cst_26 = arith.constant dense<0.000000e+00> : vector<2x32xf32>
    %80 = tpu.matmul %79, %1, %cst_26 {dimension_numbers = #tpu.dot_dimension_numbers<[1], [0], [0], [1], [0, 0, 1, 1], [], []>} : vector<2x4xbf16>, vector<4x32xbf16>, vector<2x32xf32> -> vector<2x32xf32>
    %81 = vector.broadcast %2 : vector<1x32xf32> to vector<2x32xf32>
    %82 = arith.addf %80, %81 : vector<2x32xf32>
    %cst_27 = arith.constant 0.000000e+00 : f32
    %83 = vector.broadcast %cst_27 : f32 to vector<2x32xf32>
    %84 = arith.maximumf %82, %83 : vector<2x32xf32>
    %85 = arith.addf %78, %84 : vector<2x32xf32>
    %86 = vector.extract_strided_slice %0 {offsets = [0, 48], sizes = [2, 4], strides = [1, 1]} : vector<2x64xbf16> to vector<2x4xbf16>
    %cst_28 = arith.constant dense<0.000000e+00> : vector<2x32xf32>
    %87 = tpu.matmul %86, %1, %cst_28 {dimension_numbers = #tpu.dot_dimension_numbers<[1], [0], [0], [1], [0, 0, 1, 1], [], []>} : vector<2x4xbf16>, vector<4x32xbf16>, vector<2x32xf32> -> vector<2x32xf32>
    %88 = vector.broadcast %2 : vector<1x32xf32> to vector<2x32xf32>
    %89 = arith.addf %87, %88 : vector<2x32xf32>
    %cst_29 = arith.constant 0.000000e+00 : f32
    %90 = vector.broadcast %cst_29 : f32 to vector<2x32xf32>
    %91 = arith.maximumf %89, %90 : vector<2x32xf32>
    %92 = arith.addf %85, %91 : vector<2x32xf32>
    %93 = vector.extract_strided_slice %0 {offsets = [0, 52], sizes = [2, 4], strides = [1, 1]} : vector<2x64xbf16> to vector<2x4xbf16>
    %cst_30 = arith.constant dense<0.000000e+00> : vector<2x32xf32>
    %94 = tpu.matmul %93, %1, %cst_30 {dimension_numbers = #tpu.dot_dimension_numbers<[1], [0], [0], [1], [0, 0, 1, 1], [], []>} : vector<2x4xbf16>, vector<4x32xbf16>, vector<2x32xf32> -> vector<2x32xf32>
    %95 = vector.broadcast %2 : vector<1x32xf32> to vector<2x32xf32>
    %96 = arith.addf %94, %95 : vector<2x32xf32>
    %cst_31 = arith.constant 0.000000e+00 : f32
    %97 = vector.broadcast %cst_31 : f32 to vector<2x32xf32>
    %98 = arith.maximumf %96, %97 : vector<2x32xf32>
    %99 = arith.addf %92, %98 : vector<2x32xf32>
    %100 = vector.extract_strided_slice %0 {offsets = [0, 56], sizes = [2, 4], strides = [1, 1]} : vector<2x64xbf16> to vector<2x4xbf16>
    %cst_32 = arith.constant dense<0.000000e+00> : vector<2x32xf32>
    %101 = tpu.matmul %100, %1, %cst_32 {dimension_numbers = #tpu.dot_dimension_numbers<[1], [0], [0], [1], [0, 0, 1, 1], [], []>} : vector<2x4xbf16>, vector<4x32xbf16>, vector<2x32xf32> -> vector<2x32xf32>
    %102 = vector.broadcast %2 : vector<1x32xf32> to vector<2x32xf32>
    %103 = arith.addf %101, %102 : vector<2x32xf32>
    %cst_33 = arith.constant 0.000000e+00 : f32
    %104 = vector.broadcast %cst_33 : f32 to vector<2x32xf32>
    %105 = arith.maximumf %103, %104 : vector<2x32xf32>
    %106 = arith.addf %99, %105 : vector<2x32xf32>
    %107 = vector.extract_strided_slice %0 {offsets = [0, 60], sizes = [2, 4], strides = [1, 1]} : vector<2x64xbf16> to vector<2x4xbf16>
    %cst_34 = arith.constant dense<0.000000e+00> : vector<2x32xf32>
    %108 = tpu.matmul %107, %1, %cst_34 {dimension_numbers = #tpu.dot_dimension_numbers<[1], [0], [0], [1], [0, 0, 1, 1], [], []>} : vector<2x4xbf16>, vector<4x32xbf16>, vector<2x32xf32> -> vector<2x32xf32>
    %109 = vector.broadcast %2 : vector<1x32xf32> to vector<2x32xf32>
    %110 = arith.addf %108, %109 : vector<2x32xf32>
    %cst_35 = arith.constant 0.000000e+00 : f32
    %111 = vector.broadcast %cst_35 : f32 to vector<2x32xf32>
    %112 = arith.maximumf %110, %111 : vector<2x32xf32>
    %113 = arith.addf %106, %112 : vector<2x32xf32>
    %cst_36 = arith.constant 6.250000e-02 : f32
    %114 = vector.broadcast %cst_36 : f32 to vector<2x32xf32>
    %115 = arith.mulf %113, %114 : vector<2x32xf32>
    %116 = arith.truncf %115 : vector<2x32xf32> to vector<2x32xbf16>
    %c0_37 = arith.constant 0 : index
    %c0_38 = arith.constant 0 : index
    %117 = vector.load %arg4[%c0_37, %c0_38] : memref<32x32xbf16, #tpu.memory_space<vmem>>, vector<32x32xbf16>
    %cst_39 = arith.constant dense<0.000000e+00> : vector<2x32xf32>
    %118 = tpu.matmul %116, %117, %cst_39 {dimension_numbers = #tpu.dot_dimension_numbers<[1], [0], [0], [1], [0, 0, 1, 1], [], []>} : vector<2x32xbf16>, vector<32x32xbf16>, vector<2x32xf32> -> vector<2x32xf32>
    %c0_40 = arith.constant 0 : index
    %c0_41 = arith.constant 0 : index
    %119 = vector.load %arg5[%c0_40, %c0_41] : memref<1x32xf32, #tpu.memory_space<vmem>>, vector<1x32xf32>
    %120 = vector.broadcast %119 : vector<1x32xf32> to vector<2x32xf32>
    %121 = arith.addf %118, %120 : vector<2x32xf32>
    %cst_42 = arith.constant 0.000000e+00 : f32
    %122 = vector.broadcast %cst_42 : f32 to vector<2x32xf32>
    %123 = arith.maximumf %121, %122 : vector<2x32xf32>
    %124 = arith.truncf %123 : vector<2x32xf32> to vector<2x32xbf16>
    %c0_43 = arith.constant 0 : index
    %c0_44 = arith.constant 0 : index
    %125 = vector.load %arg6[%c0_43, %c0_44] : memref<32x128xbf16, #tpu.memory_space<vmem>>, vector<32x128xbf16>
    %cst_45 = arith.constant dense<0.000000e+00> : vector<2x128xf32>
    %126 = tpu.matmul %124, %125, %cst_45 {dimension_numbers = #tpu.dot_dimension_numbers<[1], [0], [0], [1], [0, 0, 1, 1], [], []>} : vector<2x32xbf16>, vector<32x128xbf16>, vector<2x128xf32> -> vector<2x128xf32>
    %c0_46 = arith.constant 0 : index
    %c0_47 = arith.constant 0 : index
    %127 = vector.load %arg7[%c0_46, %c0_47] : memref<1x128xf32, #tpu.memory_space<vmem>>, vector<1x128xf32>
    %128 = vector.broadcast %127 : vector<1x128xf32> to vector<2x128xf32>
    %129 = arith.addf %126, %128 : vector<2x128xf32>
    %c0_48 = arith.constant 0 : index
    %c0_49 = arith.constant 0 : index
    %130 = vector.load %arg8[%c0_48, %c0_49] : memref<2x128xf32, #tpu.memory_space<vmem>>, vector<2x128xf32>
    tpu.vector_store %arg8[%c0_48, %c0_49], %129 {strides = array<i32>} : memref<2x128xf32, #tpu.memory_space<vmem>>, vector<2x128xf32>,
    return
  }
  func.func @transform_0(%arg0: i32) -> (i32, i32) {
    %c0_i32 = arith.constant 0 : i32
    %c0_i32_0 = arith.constant 0 : i32
    return %arg0, %c0_i32 : i32, i32
  }
  func.func @transform_1(%arg0: i32) -> (i32, i32) {
    %c0_i32 = arith.constant 0 : i32
    %c0_i32_0 = arith.constant 0 : i32
    %c0_i32_1 = arith.constant 0 : i32
    return %c0_i32, %c0_i32_0 : i32, i32
  }
  func.func @transform_2(%arg0: i32) -> (i32, i32) {
    %c0_i32 = arith.constant 0 : i32
    %c0_i32_0 = arith.constant 0 : i32
    %c0_i32_1 = arith.constant 0 : i32
    return %c0_i32, %c0_i32_0 : i32, i32
  }
  func.func @transform_3(%arg0: i32) -> (i32, i32) {
    %c0_i32 = arith.constant 0 : i32
    %c0_i32_0 = arith.constant 0 : i32
    %c0_i32_1 = arith.constant 0 : i32
    return %c0_i32, %c0_i32_0 : i32, i32
  }
  func.func @transform_4(%arg0: i32) -> (i32, i32) {
    %c0_i32 = arith.constant 0 : i32
    %c0_i32_0 = arith.constant 0 : i32
    %c0_i32_1 = arith.constant 0 : i32
    return %c0_i32, %c0_i32_0 : i32, i32
  }
  func.func @transform_5(%arg0: i32) -> (i32, i32) {
    %c0_i32 = arith.constant 0 : i32
    %c0_i32_0 = arith.constant 0 : i32
    %c0_i32_1 = arith.constant 0 : i32
    return %c0_i32, %c0_i32_0 : i32, i32
  }
  func.func @transform_6(%arg0: i32) -> (i32, i32) {
    %c0_i32 = arith.constant 0 : i32
    %c0_i32_0 = arith.constant 0 : i32
    %c0_i32_1 = arith.constant 0 : i32
    return %c0_i32, %c0_i32_0 : i32, i32
  }
  func.func @transform_7(%arg0: i32) -> (i32, i32) {
    %c0_i32 = arith.constant 0 : i32
    %c0_i32_0 = arith.constant 0 : i32
    return %arg0, %c0_i32 : i32, i32
  }
}

</mosaic_0001>

<bundles_post_ra>
// kernel: tpu_custom_call.1
= control target key start
LH: loop header
LB: loop body
LE: loop exit
PB: predicated region body
PF: predicated region fallthrough
CT: control target
= control target key end

     0   :  { %12 = vsyncpa [#allocation3], 0  ;;  %s1577_s0 = inlined_call_operand.hbm [shape: bf16[2,64], index: 0, kind: input, shape index: {}]   ;;  %s1578_s1 = inlined_call_operand.vmem [shape: bf16[4,32], index: 1, kind: input, shape index: {}]   ;;  %s1579_s2 = inlined_call_operand.hbm [shape: f32[1,32], index: 2, kind: input, shape index: {}]   ;;  %s1580_s3 = inlined_call_operand.hbm [shape: bf16[32,32], index: 3, kind: input, shape index: {}]   ;;  %s1581_s4 = inlined_call_operand.hbm [shape: f32[1,32], index: 4, kind: input, shape index: {}]   ;;  %s1582_s5 = inlined_call_operand.vmem [shape: bf16[32,128], index: 5, kind: input, shape index: {}]   ;;  %s1583_s6 = inlined_call_operand.vmem [shape: f32[1,128], index: 6, kind: input, shape index: {}]   ;;  %s1584_s7 = inlined_call_operand.hbm [shape: f32[2,128], index: 7, kind: output, shape index: {}]  }
   0x1   :  { %13 = vsyncpa [#allocation6], 0 }
   0x2   :  { %14 = vsyncpa [#allocation9], 0 }
   0x3   :  { %15 = vsyncpa [#allocation4], 0  ;;  %s1332_s24 = smov [#allocation5]   ;;  %s1333_s26 = smov [#allocation2]  }
   0x4   :  { %s34_s25 = sshll.u32 %s1332_s24, 4  ;;  %s22_s27 = sshll.u32 %s1333_s26, 4  ;;  %s35_s25 = int_to_ptr.vmem [resolvable:$true] %s34_s25  ;;  %s23_s27 = int_to_ptr.vmem [resolvable:$true] %s22_s27 }
   0x5   :  { %s1214_s30 = scalar_lea.hbm %s1579_s2, 16 }
   0x6   :  { %p1215_p0 = scmp.ne.s32.totalorder %s1579_s2, %s1214_s30  ;;  %p1218_p1 = scmp.lt.u32.totalorder %s1214_s30, %s1579_s2 }
   0x8   :  { %p1220_p2 = pnand %p1218_p1, %p1215_p0 }
   0xa   :  { %1223 = shalt.err (!%p1220_p2)
}
   0xb   :  { %s1224_s12 = scalar_lea.vmem %s35_s25, 16  ;;  %s1228_s13 = scalar_lea.vmem %s35_s25, 32 }
   0xc   :  { %p1225_p3 = scmp.ne.s32.totalorder %s35_s25, %s1224_s12  ;;  %p1229_p4 = scmp.lt.s32.totalorder %s35_s25, %s35_s25 }
   0xd   :  { %p1230_p5 = scmp.lt.s32.totalorder %s1228_s13, %s1224_s12 }
   0xf   :  { %p1231_p6 = por %p1230_p5, %p1229_p4 }
  0x11   :  { %p1232_p7 = pnand %p1231_p6, %p1225_p3 }
  0x13   :  { %1235 = shalt.err (!%p1232_p7)
}
  0x14   :  { %37 = dma.hbm_to_vmem [thread:$0]  %s1579_s2, 16, %s35_s25, [#allocation6]  }
  0x15   :  { %s1236_s18 = scalar_lea.hbm %s1577_s0, 16 }
  0x16   :  { %p1237_p8 = scmp.ne.s32.totalorder %s1577_s0, %s1236_s18  ;;  %p1240_p9 = scmp.lt.u32.totalorder %s1236_s18, %s1577_s0 }
  0x18   :  { %p1242_p10 = pnand %p1240_p9, %p1237_p8 }
  0x1a   :  { %1245 = shalt.err (!%p1242_p10)
}
  0x1b   :  { %s1246_s23 = scalar_lea.vmem %s23_s27, 16  ;;  %s1250_s24 = scalar_lea.vmem %s23_s27, 32 }
  0x1c   :  { %p1247_p11 = scmp.ne.s32.totalorder %s23_s27, %s1246_s23  ;;  %p1251_p12 = scmp.lt.s32.totalorder %s23_s27, %s23_s27 }
  0x1d   :  { %p1252_p13 = scmp.lt.s32.totalorder %s1250_s24, %s1246_s23 }
  0x1f   :  { %p1253_p0 = por %p1252_p13, %p1251_p12 }
  0x21   :  { %p1254_p1 = pnand %p1253_p0, %p1247_p11 }
  0x23   :  { %1257 = shalt.err (!%p1254_p1)
}
  0x24   :  { %25 = dma.hbm_to_vmem [thread:$0]  %s1577_s0, 16, %s23_s27, [#allocation3]  }
  0x25   :  { %s1334_s26 = smov [#allocation7]   ;;  %s1258_s8 = scalar_lea.hbm %s1580_s3, 256 }
  0x26   :  { %s43_s28 = sshll.u32 %s1334_s26, 4  ;;  %p1259_p2 = scmp.ne.s32.totalorder %s1580_s3, %s1258_s8  ;;  %s44_s28 = int_to_ptr.vmem [resolvable:$true] %s43_s28 }
  0x27   :  { %p1262_p3 = scmp.lt.u32.totalorder %s1258_s8, %s1580_s3 }
  0x29   :  { %p1264_p4 = pnand %p1262_p3, %p1259_p2 }
  0x2b   :  { %1267 = shalt.err (!%p1264_p4)
}
  0x2c   :  { %s1268_s13 = scalar_lea.vmem %s44_s28, 256  ;;  %p1273_p6 = scmp.lt.s32.totalorder %s44_s28, %s44_s28 }
  0x2d   :  { %p1269_p5 = scmp.ne.s32.totalorder %s44_s28, %s1268_s13  ;;  %p1274_p7 = scmp.lt.s32.totalorder %s1268_s13, %s1268_s13 }
  0x2f   :  { %p1275_p8 = por %p1274_p7, %p1273_p6 }
  0x31   :  { %p1276_p9 = pnand %p1275_p8, %p1269_p5 }
  0x33   :  { %1279 = shalt.err (!%p1276_p9)
}
  0x34   :  { %s1335_s0 = smov 64   ;;  %s1336_s27 = smov 4  }
  0x35   :  { %49 = dma.hbm_to_vmem [thread:$0]  %s1580_s3, 256, %s44_s28, [#allocation6], %s1335_s0, %s1335_s0, %s1336_s27  }
  0x36   :  { %s1337_s16 = smov [#allocation8]   ;;  %s1280_s20 = scalar_lea.hbm %s1581_s4, 16 }
  0x37   :  { %s56_s17 = sshll.u32 %s1337_s16, 4  ;;  %p1281_p10 = scmp.ne.s32.totalorder %s1581_s4, %s1280_s20  ;;  %s57_s17 = int_to_ptr.vmem [resolvable:$true] %s56_s17 }
  0x38   :  { %p1284_p11 = scmp.lt.u32.totalorder %s1280_s20, %s1581_s4 }
  0x3a   :  { %p1286_p12 = pnand %p1284_p11, %p1281_p10 }
  0x3c   :  { %1289 = shalt.err (!%p1286_p12)
}
  0x3d   :  { %s1290_s2 = scalar_lea.vmem %s57_s17, 16  ;;  %s1294_s3 = scalar_lea.vmem %s57_s17, 32 }
  0x3e   :  { %p1291_p13 = scmp.ne.s32.totalorder %s57_s17, %s1290_s2  ;;  %p1295_p0 = scmp.lt.s32.totalorder %s57_s17, %s57_s17 }
  0x3f   :  { %p1296_p1 = scmp.lt.s32.totalorder %s1294_s3, %s1290_s2 }
  0x41   :  { %p1297_p2 = por %p1296_p1, %p1295_p0 }
  0x43   :  { %p1298_p3 = pnand %p1297_p2, %p1291_p13 }
  0x45   :  { %1301 = shalt.err (!%p1298_p3)
}
  0x46   :  { %59 = dma.hbm_to_vmem [thread:$0]  %s1581_s4, 16, %s57_s17, [#allocation9]  }
  0x47   :  { %1324 = dma.done.wait [#allocation3], 16  }
  0x48   :  { %1325 = vsyncadd [#allocation3], 4294967280 }
  0x49   :  { %1326 = dma.done.wait [#allocation6], 272  }
  0x4a   :  { %1327 = vsyncadd [#allocation6], 4294967024 }
  0x4b   :  { %1328 = dma.done.wait [#allocation9], 16  }
  0x4c   :  { %1329 = vsyncadd [#allocation9], 4294967280  ;;  %v139_v0 = vlaneseq  ;;  %v1338_v1 = vmov 1966171168   ;;  %v1339_v4 = vmov 0.0   ;;  %vm1340_vm0 = vmmov 0  }
  0x4d   :  { %v137_v2 = vunpack.c.l.s4 %v1338_v1  ;;  %1073 = vmatprep.subr.bf16.mxu0 %v1339_v4  ;;  %1075 = vmatprep.mubr.msk.bf16.mxu0 %vm1340_vm0, %v1339_v4  ;;  %vm90_vm1 = vcmask 1041408   ;;  %v77_v7 = vld [vmem:[#allocation2] sm:$0x1]  ;;  %v78_v8 = vld [vmem:[%s1578_s1] sm:$0x3]  ;;  %vm86_vm2 = vcmask 31744  }
  0x4e   :  { %v140_v3 = vshrl.u32 %v139_v0, 7  ;;  %1079 = vmatprep.subr.bf16.mxu1 %v1339_v4  ;;  %1081 = vmatprep.mubr.msk.bf16.mxu1 %vm1340_vm0, %v1339_v4  ;;  %v1454_v10 = vsel %vm90_vm1, %v78_v8, 0  ;;  %s1341_s29 = smov 124   ;;  %s1342_s30 = smov 116   ;;  %v1210_v31 = vld [vmem:[#allocation7] sm:$0xff]   ;;  %v1211_v32 = vld [vmem:[#allocation7 + $0x8] sm:$0xff]  }
  0x4f   :  { %v138_v5 = vunpack.c.0.s8 %v137_v2  ;;  %1074 = vmatpush3.bf16.msra.mxu0 %v1454_v10  ;;  %1080 = vmatpush3.bf16.msra.mxu1 %v1454_v10  ;;  %s1343_s1 = smov 120   ;;  %s1344_s8 = smov 112   ;;  %v1212_v33 = vld [vmem:[%s1582_s5] sm:$0xff]   ;;  %v1541_v34 = vld [vmem:[#allocation5] ss:$0 sm:$0xff]  ;;  %vm880_vm3 = vcmask 261120  }
  0x50   :  { %1085 = vmatprep.subr.bf16.mxu0 %v1339_v4  ;;  %1091 = vmatprep.subr.bf16.mxu1 %v1339_v4  ;;  %s1345_s9 = smov 108   ;;  %s1346_s10 = smov 104  }
  0x51   :  { %v141_v6 = vsub.s32 %v138_v5, %v140_v3  ;;  %s1347_s11 = smov 100   ;;  %s1348_s12 = smov 96  }
  0x52   :  { %1076 = vmatmul.mubr.msk.bf16.vlgmr.msra.gmra.mrb[0].mxu0 %vm86_vm2, %v77_v7  ;;  %s1349_s13 = smov 92   ;;  %s1350_s0 = smov 88  }
  0x53   :  { %v142_v9 = vrot.slane %v77_v7, %v141_v6  ;;  %1086 = vmatpush3.bf16.msra.mxu0 %v1454_v10  ;;  %1087 = vmatprep.mubr.msk.bf16.mxu0 %vm1340_vm0, %v1339_v4  ;;  %s1351_s27 = smov 84   ;;  %s1352_s14 = smov 80  }
  0x54   :  { %1097 = vmatprep.subr.bf16.mxu0 %v1339_v4  ;;  %s1353_s15 = smov 76   ;;  %s1354_s16 = smov 72  }
  0x55   :  { %v149_v11 = vrot.slane %v142_v9, %v141_v6  ;;  %s1355_s17 = smov 68   ;;  %s1356_s24 = smov [#allocation10]  }
  0x56   :  { %s999_s2 = sshll.u32 %s1356_s24, 4  ;;  %s1000_s2 = int_to_ptr.vmem [resolvable:$true] %s999_s2 }
  0x57   :  { %150 = vrot.lane.b32.xlu0 %v149_v11, %s1341_s29  ;;  %244 = vrot.lane.b32.xlu1 %v149_v11, %s1342_s30  ;;  %p1307_p5 = scmp.lt.s32.totalorder %s1000_s2, %s1000_s2 }
  0x5b   :  { %197 = vrot.lane.b32.xlu0 %v149_v11, %s1343_s1  ;;  %291 = vrot.lane.b32.xlu1 %v149_v11, %s1344_s8 }
  0x5f   :  { %338 = vrot.lane.b32.xlu0 %v149_v11, %s1345_s9  ;;  %385 = vrot.lane.b32.xlu1 %v149_v11, %s1346_s10 }
  0x63   :  { %432 = vrot.lane.b32.xlu0 %v149_v11, %s1347_s11  ;;  %479 = vrot.lane.b32.xlu1 %v149_v11, %s1348_s12 }
  0x67   :  { %526 = vrot.lane.b32.xlu0 %v149_v11, %s1349_s13  ;;  %573 = vrot.lane.b32.xlu1 %v149_v11, %s1350_s0 }
  0x6b   :  { %620 = vrot.lane.b32.xlu0 %v149_v11, %s1351_s27  ;;  %667 = vrot.lane.b32.xlu1 %v149_v11, %s1352_s14 }
  0x6f   :  { %714 = vrot.lane.b32.xlu0 %v149_v11, %s1353_s15  ;;  %761 = vrot.lane.b32.xlu1 %v149_v11, %s1354_s16 }
  0x73   :  { %808 = vrot.lane.b32.xlu0 %v149_v11, %s1355_s17 }
  0xc9   :  { %v151_v12 = vpop.permute.xlu0 %150  ;;  %v245_v14 = vpop.permute.xlu1 %244 }
  0xca   :  { %1082 = vmatmul.mubr.msk.bf16.vlgmr.msra.gmra.mrb[0].mxu1 %vm86_vm2, %v151_v12 }
  0xcb   :  { %1092 = vmatpush3.bf16.msra.mxu1 %v1454_v10  ;;  %1093 = vmatprep.mubr.msk.bf16.mxu1 %vm1340_vm0, %v1339_v4 }
  0xcc   :  { %1103 = vmatprep.subr.bf16.mxu1 %v1339_v4 }
  0xcd   :  { %v198_v13 = vpop.permute.xlu0 %197  ;;  %v292_v15 = vpop.permute.xlu1 %291 }
  0xce   :  { %1088 = vmatmul.mubr.msk.bf16.vlgmr.msra.gmra.mrb[4].mxu0 %vm86_vm2, %v198_v13 }
  0xcf   :  { %1098 = vmatpush3.bf16.msra.mxu0 %v1454_v10  ;;  %1099 = vmatprep.mubr.msk.bf16.mxu0 %vm1340_vm0, %v1339_v4 }
  0xd0   :  { %1109 = vmatprep.subr.bf16.mxu0 %v1339_v4 }
  0xd1   :  { %v339_v16 = vpop.permute.xlu0 %338  ;;  %v386_v17 = vpop.permute.xlu1 %385 }
  0xd2   :  { %1094 = vmatmul.mubr.msk.bf16.vlgmr.msra.gmra.mrb[4].mxu1 %vm86_vm2, %v245_v14 }
  0xd3   :  { %1104 = vmatpush3.bf16.msra.mxu1 %v1454_v10  ;;  %1105 = vmatprep.mubr.msk.bf16.mxu1 %vm1340_vm0, %v1339_v4 }
  0xd4   :  { %1115 = vmatprep.subr.bf16.mxu1 %v1339_v4 }
  0xd5   :  { %v433_v18 = vpop.permute.xlu0 %432  ;;  %v480_v19 = vpop.permute.xlu1 %479 }
  0xd6   :  { %1100 = vmatmul.mubr.msk.bf16.vlgmr.msra.gmra.mrb[8].mxu0 %vm86_vm2, %v292_v15 }
  0xd7   :  { %1110 = vmatpush3.bf16.msra.mxu0 %v1454_v10  ;;  %1111 = vmatprep.mubr.msk.bf16.mxu0 %vm1340_vm0, %v1339_v4 }
  0xd8   :  { %1121 = vmatprep.subr.bf16.mxu0 %v1339_v4 }
  0xd9   :  { %v527_v20 = vpop.permute.xlu0 %526  ;;  %v574_v21 = vpop.permute.xlu1 %573 }
  0xda   :  { %1106 = vmatmul.mubr.msk.bf16.vlgmr.msra.gmra.mrb[8].mxu1 %vm86_vm2, %v339_v16 }
  0xdb   :  { %1116 = vmatpush3.bf16.msra.mxu1 %v1454_v10  ;;  %1117 = vmatprep.mubr.msk.bf16.mxu1 %vm1340_vm0, %v1339_v4 }
  0xdc   :  { %1127 = vmatprep.subr.bf16.mxu1 %v1339_v4 }
  0xdd   :  { %v621_v22 = vpop.permute.xlu0 %620  ;;  %v668_v23 = vpop.permute.xlu1 %667 }
  0xde   :  { %1112 = vmatmul.mubr.msk.bf16.vlgmr.msra.gmra.mrb[12].mxu0 %vm86_vm2, %v386_v17 }
  0xdf   :  { %1122 = vmatpush3.bf16.msra.mxu0 %v1454_v10  ;;  %1123 = vmatprep.mubr.msk.bf16.mxu0 %vm1340_vm0, %v1339_v4 }
  0xe0   :  { %1133 = vmatprep.subr.bf16.mxu0 %v1339_v4 }
  0xe1   :  { %v715_v24 = vpop.permute.xlu0 %714  ;;  %v762_v25 = vpop.permute.xlu1 %761 }
  0xe2   :  { %1118 = vmatmul.mubr.msk.bf16.vlgmr.msra.gmra.mrb[12].mxu1 %vm86_vm2, %v433_v18 }
  0xe3   :  { %1128 = vmatpush3.bf16.msra.mxu1 %v1454_v10  ;;  %1129 = vmatprep.mubr.msk.bf16.mxu1 %vm1340_vm0, %v1339_v4 }
  0xe4   :  { %1139 = vmatprep.subr.bf16.mxu1 %v1339_v4 }
  0xe5   :  { %v809_v26 = vpop.permute.xlu0 %808 }
  0xe6   :  { %1124 = vmatmul.mubr.msk.bf16.vlgmr.msra.gmra.mrb[16].mxu0 %vm86_vm2, %v480_v19 }
  0xe7   :  { %1134 = vmatpush3.bf16.msra.mxu0 %v1454_v10  ;;  %1135 = vmatprep.mubr.msk.bf16.mxu0 %vm1340_vm0, %v1339_v4 }
  0xe8   :  { %1145 = vmatprep.subr.bf16.mxu0 %v1339_v4 }
  0xea   :  { %1130 = vmatmul.mubr.msk.bf16.vlgmr.msra.gmra.mrb[16].mxu1 %vm86_vm2, %v527_v20 }
  0xeb   :  { %1140 = vmatpush3.bf16.msra.mxu1 %v1454_v10  ;;  %1141 = vmatprep.mubr.msk.bf16.mxu1 %vm1340_vm0, %v1339_v4 }
  0xec   :  { %1151 = vmatprep.subr.bf16.mxu1 %v1339_v4 }
  0xee   :  { %1136 = vmatmul.mubr.msk.bf16.vlgmr.msra.gmra.mrb[20].mxu0 %vm86_vm2, %v574_v21 }
  0xef   :  { %1146 = vmatpush3.bf16.msra.mxu0 %v1454_v10  ;;  %1147 = vmatprep.mubr.msk.bf16.mxu0 %vm1340_vm0, %v1339_v4 }
  0xf0   :  { %1157 = vmatprep.subr.bf16.mxu0 %v1339_v4 }
  0xf2   :  { %1142 = vmatmul.mubr.msk.bf16.vlgmr.msra.gmra.mrb[20].mxu1 %vm86_vm2, %v621_v22 }
  0xf3   :  { %1152 = vmatpush3.bf16.msra.mxu1 %v1454_v10  ;;  %1153 = vmatprep.mubr.msk.bf16.mxu1 %vm1340_vm0, %v1339_v4 }
  0xf4   :  { %1163 = vmatprep.subr.bf16.mxu1 %v1339_v4 }
  0xf6   :  { %1148 = vmatmul.mubr.msk.bf16.vlgmr.msra.gmra.mrb[24].mxu0 %vm86_vm2, %v668_v23 }
  0xf7   :  { %1158 = vmatpush3.bf16.msra.mxu0 %v1454_v10  ;;  %1159 = vmatprep.mubr.msk.bf16.mxu0 %vm1340_vm0, %v1339_v4 }
  0xf8   :  { %1169 = vmatprep.subr.bf16.mxu0 %v1339_v4 }
  0xfa   :  { %1154 = vmatmul.mubr.msk.bf16.vlgmr.msra.gmra.mrb[24].mxu1 %vm86_vm2, %v715_v24 }
  0xfb   :  { %1164 = vmatpush3.bf16.msra.mxu1 %v1454_v10  ;;  %1165 = vmatprep.mubr.msk.bf16.mxu1 %vm1340_vm0, %v1339_v4 }
  0xfc   :  { %1177 = vmatprep.subr.bf16.mxu1 %v1339_v4 }
  0xfe   :  { %1160 = vmatmul.mubr.msk.bf16.vlgmr.msra.gmra.mrb[28].mxu0 %vm86_vm2, %v762_v25 }
  0xff   :  { %1173 = vmatprep.mubr.msk.bf16.mxu0 %vm1340_vm0, %v1339_v4  ;;  %1170 = vmatpush3.bf16.msra.mxu0 %v1210_v31 }
 0x100   :  { %1171 = vmatprep.subr.bf16.mxu0 %v1339_v4 }
 0x102   :  { %1166 = vmatmul.mubr.msk.bf16.vlgmr.msra.gmra.mrb[28].mxu1 %vm86_vm2, %v809_v26 }
 0x103   :  { %1181 = vmatprep.mubr.msk.bf16.mxu1 %vm1340_vm0, %v1339_v4  ;;  %1172 = vmatpush3.bf16.msra.mxu0 %v1211_v32 }
 0x104   :  { %1178 = vmatpush3.bf16.msra.mxu1 %v1212_v33 }
 0x105   :  { %1179 = vmatprep.subr.bf16.mxu1 %v1339_v4 }
 0x125   :  { %v128_v27 = vpop.f32.mrb[0].mxu0 }
 0x126   :  { %v1077_v28 = vpop.f32.mrb[1].mxu0  ;;  %v129_v35 = vadd.f32 %v1541_v34, %v128_v27 }
 0x127   :  { %v131_v29 = vpop.f32.mrb[2].mxu0 }
 0x128   :  { %v1078_v30 = vpop.f32.mrb[3].mxu0  ;;  %v134_v40 = vmax.f32 %v129_v35, 0.0 }
 0x19d   :  { %v189_v36 = vpop.f32.mrb[0].mxu1 }
 0x19e   :  { %v190_v37 = vadd.f32 %v1541_v34, %v189_v36  ;;  %v1083_v38 = vpop.f32.mrb[1].mxu1 }
 0x19f   :  { %v192_v39 = vpop.f32.mrb[2].mxu1 }
 0x1a0   :  { %v195_v41 = vmax.f32 %v190_v37, 0.0  ;;  %v1084_v42 = vpop.f32.mrb[3].mxu1 }
 0x1a1   :  { %v236_v43 = vpop.f32.mrb[4].mxu0 }
 0x1a2   :  { %v196_v44 = vadd.f32 %v195_v41, %v134_v40  ;;  %v237_v45 = vadd.f32 %v1541_v34, %v236_v43  ;;  %v1089_v46 = vpop.f32.mrb[5].mxu0 }
 0x1a3   :  { %v239_v47 = vpop.f32.mrb[6].mxu0 }
 0x1a4   :  { %v242_v48 = vmax.f32 %v237_v45, 0.0  ;;  %v1090_v49 = vpop.f32.mrb[7].mxu0 }
 0x1a5   :  { %v283_v50 = vpop.f32.mrb[4].mxu1 }
 0x1a6   :  { %v243_v51 = vadd.f32 %v242_v48, %v196_v44  ;;  %v284_v52 = vadd.f32 %v1541_v34, %v283_v50  ;;  %v1095_v53 = vpop.f32.mrb[5].mxu1 }
 0x1a7   :  { %v286_v54 = vpop.f32.mrb[6].mxu1 }
 0x1a8   :  { %v289_v55 = vmax.f32 %v284_v52, 0.0  ;;  %v1096_v56 = vpop.f32.mrb[7].mxu1 }
 0x1a9   :  { %v330_v57 = vpop.f32.mrb[8].mxu0 }
 0x1aa   :  { %v290_v58 = vadd.f32 %v289_v55, %v243_v51  ;;  %v331_v59 = vadd.f32 %v1541_v34, %v330_v57  ;;  %v1101_v60 = vpop.f32.mrb[9].mxu0 }
 0x1ab   :  { %v333_v61 = vpop.f32.mrb[10].mxu0 }
 0x1ac   :  { %v336_v62 = vmax.f32 %v331_v59, 0.0  ;;  %v1102_v63 = vpop.f32.mrb[11].mxu0 }
 0x1ad   :  { %v377_v0 = vpop.f32.mrb[8].mxu1 }
 0x1ae   :  { %v337_v1 = vadd.f32 %v336_v62, %v290_v58  ;;  %v378_v2 = vadd.f32 %v1541_v34, %v377_v0  ;;  %v1107_v3 = vpop.f32.mrb[9].mxu1 }
 0x1af   :  { %v380_v4 = vpop.f32.mrb[10].mxu1 }
 0x1b0   :  { %v383_v5 = vmax.f32 %v378_v2, 0.0  ;;  %v1108_v6 = vpop.f32.mrb[11].mxu1 }
 0x1b1   :  { %v424_v7 = vpop.f32.mrb[12].mxu0 }
 0x1b2   :  { %v384_v8 = vadd.f32 %v383_v5, %v337_v1  ;;  %v425_v9 = vadd.f32 %v1541_v34, %v424_v7  ;;  %v1113_v10 = vpop.f32.mrb[13].mxu0 }
 0x1b3   :  { %v427_v11 = vpop.f32.mrb[14].mxu0 }
 0x1b4   :  { %v430_v12 = vmax.f32 %v425_v9, 0.0  ;;  %v1114_v13 = vpop.f32.mrb[15].mxu0 }
 0x1b5   :  { %v471_v14 = vpop.f32.mrb[12].mxu1 }
 0x1b6   :  { %v431_v15 = vadd.f32 %v430_v12, %v384_v8  ;;  %v472_v16 = vadd.f32 %v1541_v34, %v471_v14  ;;  %v1119_v17 = vpop.f32.mrb[13].mxu1 }
 0x1b7   :  { %v474_v18 = vpop.f32.mrb[14].mxu1  ;;  %v1213_v17 = vld [vmem:[%s1582_s5 + $0x8] sm:$0xff]   ;;  %s1302_s5 = scalar_lea.vmem %s1000_s2, 32 }
 0x1b8   :  { %v477_v19 = vmax.f32 %v472_v16, 0.0  ;;  %v1120_v20 = vpop.f32.mrb[15].mxu1  ;;  %1180 = vmatpush3.bf16.msra.mxu1 %v1213_v17  ;;  %v1027_v18 = vld [vmem:[#allocation8] ss:$0 sm:$0xff]  ;;  %p1303_p4 = scmp.ne.s32.totalorder %s1000_s2, %s1302_s5  ;;  %p1308_p6 = scmp.lt.s32.totalorder %s1302_s5, %s1302_s5 }
 0x1b9   :  { %v518_v21 = vpop.f32.mrb[16].mxu0 }
 0x1ba   :  { %v478_v22 = vadd.f32 %v477_v19, %v431_v15  ;;  %v519_v23 = vadd.f32 %v1541_v34, %v518_v21  ;;  %v1125_v24 = vpop.f32.mrb[17].mxu0  ;;  %p1309_p7 = por %p1308_p6, %p1307_p5 }
 0x1bb   :  { %v521_v25 = vpop.f32.mrb[18].mxu0 }
 0x1bc   :  { %v524_v26 = vmax.f32 %v519_v23, 0.0  ;;  %v1126_v27 = vpop.f32.mrb[19].mxu0  ;;  %v1031_v25 = vld [vmem:[%s1583_s6] ss:$0 sm:$0xff]  ;;  %p1310_p8 = pnand %p1309_p7, %p1303_p4 }
 0x1bd   :  { %v565_v28 = vpop.f32.mrb[16].mxu1 }
 0x1be   :  { %v525_v29 = vadd.f32 %v524_v26, %v478_v22  ;;  %v566_v30 = vadd.f32 %v1541_v34, %v565_v28  ;;  %v1131_v31 = vpop.f32.mrb[17].mxu1 }
 0x1bf   :  { %v568_v32 = vpop.f32.mrb[18].mxu1 }
 0x1c0   :  { %v571_v33 = vmax.f32 %v566_v30, 0.0  ;;  %v1132_v35 = vpop.f32.mrb[19].mxu1 }
 0x1c1   :  { %v612_v36 = vpop.f32.mrb[20].mxu0 }
 0x1c2   :  { %v572_v37 = vadd.f32 %v571_v33, %v525_v29  ;;  %v613_v38 = vadd.f32 %v1541_v34, %v612_v36  ;;  %v1137_v39 = vpop.f32.mrb[21].mxu0 }
 0x1c3   :  { %v615_v40 = vpop.f32.mrb[22].mxu0 }
 0x1c4   :  { %v618_v41 = vmax.f32 %v613_v38, 0.0  ;;  %v1138_v42 = vpop.f32.mrb[23].mxu0 }
 0x1c5   :  { %v659_v43 = vpop.f32.mrb[20].mxu1 }
 0x1c6   :  { %v619_v44 = vadd.f32 %v618_v41, %v572_v37  ;;  %v660_v45 = vadd.f32 %v1541_v34, %v659_v43  ;;  %v1143_v46 = vpop.f32.mrb[21].mxu1 }
 0x1c7   :  { %v662_v47 = vpop.f32.mrb[22].mxu1 }
 0x1c8   :  { %v665_v48 = vmax.f32 %v660_v45, 0.0  ;;  %v1144_v49 = vpop.f32.mrb[23].mxu1 }
 0x1c9   :  { %v706_v50 = vpop.f32.mrb[24].mxu0 }
 0x1ca   :  { %v666_v51 = vadd.f32 %v665_v48, %v619_v44  ;;  %v707_v52 = vadd.f32 %v1541_v34, %v706_v50  ;;  %v1149_v53 = vpop.f32.mrb[25].mxu0 }
 0x1cb   :  { %v709_v54 = vpop.f32.mrb[26].mxu0 }
 0x1cc   :  { %v712_v55 = vmax.f32 %v707_v52, 0.0  ;;  %v1150_v56 = vpop.f32.mrb[27].mxu0 }
 0x1cd   :  { %v753_v57 = vpop.f32.mrb[24].mxu1 }
 0x1ce   :  { %v713_v58 = vadd.f32 %v712_v55, %v666_v51  ;;  %v754_v59 = vadd.f32 %v1541_v34, %v753_v57  ;;  %v1155_v60 = vpop.f32.mrb[25].mxu1 }
 0x1cf   :  { %v756_v61 = vpop.f32.mrb[26].mxu1 }
 0x1d0   :  { %v759_v62 = vmax.f32 %v754_v59, 0.0  ;;  %v1156_v63 = vpop.f32.mrb[27].mxu1 }
 0x1d1   :  { %v800_v0 = vpop.f32.mrb[28].mxu0 }
 0x1d2   :  { %v760_v1 = vadd.f32 %v759_v62, %v713_v58  ;;  %v801_v2 = vadd.f32 %v1541_v34, %v800_v0  ;;  %v1161_v3 = vpop.f32.mrb[29].mxu0 }
 0x1d3   :  { %v803_v4 = vpop.f32.mrb[30].mxu0 }
 0x1d4   :  { %v806_v5 = vmax.f32 %v801_v2, 0.0  ;;  %v1162_v6 = vpop.f32.mrb[31].mxu0 }
 0x1d5   :  { %v847_v7 = vpop.f32.mrb[28].mxu1 }
 0x1d6   :  { %v807_v8 = vadd.f32 %v806_v5, %v760_v1  ;;  %v848_v9 = vadd.f32 %v1541_v34, %v847_v7  ;;  %v1167_v10 = vpop.f32.mrb[29].mxu1 }
 0x1d7   :  { %v850_v11 = vpop.f32.mrb[30].mxu1 }
 0x1d8   :  { %v853_v12 = vmax.f32 %v848_v9, 0.0  ;;  %v1168_v13 = vpop.f32.mrb[31].mxu1 }
 0x1da   :  { %v854_v14 = vadd.f32 %v853_v12, %v807_v8 }
 0x1dc   :  { %v855_v15 = vmul.f32 0.0625, %v854_v14 }
 0x1de   :  { %v856_v16 = vpack.c.bf16 %v855_v15, %v855_v15 }
 0x1e0   :  { %1174 = vmatmul.mubr.msk.bf16.vlgmr.msra.gmra.mrb[32].mxu0 %vm880_vm3, %v856_v16 }
 0x2b3   :  { %v918_v19 = vpop.f32.mrb[32].mxu0 }
 0x2b4   :  { %v919_v20 = vadd.f32 %v1027_v18, %v918_v19  ;;  %v1175_v21 = vpop.f32.mrb[33].mxu0 }
 0x2b5   :  { %v921_v22 = vpop.f32.mrb[34].mxu0 }
 0x2b6   :  { %v924_v34 = vmax.f32 %v919_v20, 0.0  ;;  %v1176_v23 = vpop.f32.mrb[35].mxu0 }
 0x2b8   :  { %v925_v24 = vpack.c.bf16 %v924_v34, %v924_v34 }
 0x2ba   :  { %1182 = vmatmul.mubr.msk.bf16.vlgmr.msra.gmra.mrb[32].mxu1 %vm880_vm3, %v925_v24 }
 0x38d   :  { %v986_v26 = vpop.f32.mrb[32].mxu1 }
 0x38e   :  { %v987_v27 = vadd.f32 %v1031_v25, %v986_v26  ;;  %v1183_v28 = vpop.f32.mrb[33].mxu1 }
 0x38f   :  { %v989_v29 = vpop.f32.mrb[34].mxu1 }
 0x390   :  { %992 = vst [vmem:[#allocation10] sm:$0x3] %v987_v27  ;;  %v1184_v30 = vpop.f32.mrb[35].mxu1 }
 0x391   :  { %1313 = shalt.err (!%p1310_p8)
}
 0x392   :  { %s1314_s6 = scalar_lea.hbm %s1584_s7, 32 }
 0x393   :  { %p1315_p9 = scmp.ne.s32.totalorder %s1584_s7, %s1314_s6  ;;  %p1318_p10 = scmp.lt.u32.totalorder %s1314_s6, %s1584_s7 }
 0x395   :  { %p1320_p11 = pnand %p1318_p10, %p1315_p9 }
 0x397   :  { %1323 = shalt.err (!%p1320_p11)
}
 0x398   :  { %1002 = dma.vmem_to_hbm [thread:$0]  %s1000_s2, 32, %s1584_s7, [#allocation4]  }
 0x399   :  { %1330 = dma.done.wait [#allocation4], 32  }
 0x39a   :  { %1331 = vsyncadd [#allocation4], 4294967264 }
 0x39b   :  { %1006 = vsyncpa [#allocation3], 1 }
 0x39c   :  { %1007 = vsyncpa [#allocation6], 1 }
 0x39d   :  { %1008 = vsyncpa [#allocation9], 1 }
 0x39e   :  { %1009 = vsyncpa [#allocation4], 1 }

</bundles_post_ra>
